<compile_context>
chip_gen: v7x
topology: tpu7x:2x2x1
jax: 0.10.0
libtpu: 0.0.40
codegen_flags: <defaults>
</compile_context>

<pallas_src>
import functools

import jax
import jax.numpy as jnp
from jax.experimental import pallas as pl
from jax.experimental.pallas import tpu as pltpu

LOGITS = 2     # real width of the final Linear(D, 2)
LANE = 128     # TPU lane width; feature / logit dims are padded to multiples of this


def _round_up(x, m):
    return (x + m - 1) // m * m


def _leaky_relu(v, slope=0.2):
    # For 0 < slope < 1:  max(v, slope*v) == LeakyReLU(slope)(v)
    return jnp.maximum(v, slope * v)


@functools.lru_cache(maxsize=None)
def _single_buffer_supported():
    """Probe whether this jax build accepts pl.Buffered(1) (single-buffered
    resident operands).  If not, fall back to default double-buffering."""
    if not hasattr(pl, "Buffered"):
        return False
    try:
        def _probe(x_ref, o_ref):
            o_ref[...] = x_ref[...] + 1.0

        spec = pl.BlockSpec((8, 128), lambda i: (0, 0),
                            pipeline_mode=pl.Buffered(1))
        out = pl.pallas_call(
            _probe,
            out_shape=jax.ShapeDtypeStruct((8, 128), jnp.float32),
            grid=(2,),
            in_specs=[spec],
            out_specs=pl.BlockSpec((8, 128), lambda i: (0, 0)),
        )(jnp.zeros((8, 128), jnp.float32))
        jax.block_until_ready(out)
        return True
    except Exception:
        return False


def _pick_tile_b(B):
    """Batch tile: >=16 rows (bf16 sublane packing for the x block), at most
    256 (fills the 256-wide MXU on v6e/v7x), no huge padding for tiny batches,
    and >=2 grid steps for mid-size batches so the 'parallel' batch axis can
    shard across v7x's two TensorCores."""
    Bp = _round_up(max(B, 1), 16)
    if Bp <= 32:
        return Bp
    if Bp <= 512 and Bp % 32 == 0:
        return Bp // 2
    return min(Bp, 256)


def discriminator_kernel(x_ref,
                         w1_ref, b1_ref,
                         w2_ref, b2_ref,
                         w3_ref, b3_ref,
                         w4_ref, b4_ref,
                         o_ref):
    """One batch tile of the MLP. x_ref: (tile_b, Dp) bf16; weights bf16,
    biases f32; o_ref: (tile_b, 128) f32 (logits live in columns 0:2)."""
    x = x_ref[...]                                                       # bf16

    h = jnp.dot(x, w1_ref[...], preferred_element_type=jnp.float32) + b1_ref[...]
    h = _leaky_relu(h).astype(jnp.bfloat16)
    # Dropout(p=0.25): identity in eval mode.

    h = jnp.dot(h, w2_ref[...], preferred_element_type=jnp.float32) + b2_ref[...]
    h = _leaky_relu(h).astype(jnp.bfloat16)
    # Dropout(p=0.25): identity in eval mode.

    h = jnp.dot(h, w3_ref[...], preferred_element_type=jnp.float32) + b3_ref[...]
    h = _leaky_relu(h).astype(jnp.bfloat16)

    out = jnp.dot(h, w4_ref[...], preferred_element_type=jnp.float32) + b4_ref[...]
    o_ref[...] = out.astype(o_ref.dtype)               # lane-dense (tile_b, 128) store


def prepare_params(params):
    """One-time weight preparation: zero-pad to lane multiples and cast to
    bf16.  After this, each forward call's only weight traffic is the
    kernel's own (VMEM-resident) DMA."""
    D = params["w1"].shape[0]
    Dp = _round_up(D, LANE)       # padded feature width
    Np = LANE                     # padded logit width (lane-dense output)

    def pad_w(w, d_out_pad):
        return (jnp.zeros((Dp, d_out_pad), jnp.bfloat16)
                .at[:w.shape[0], :w.shape[1]].set(w.astype(jnp.bfloat16)))

    def pad_b(b, d_out_pad):
        return (jnp.zeros((1, d_out_pad), jnp.float32)
                .at[:, :b.shape[1]].set(b.astype(jnp.float32)))

    prepped = {
        "D": D, "Dp": Dp,
        "w1": pad_w(params["w1"], Dp), "b1": pad_b(params["b1"], Dp),
        "w2": pad_w(params["w2"], Dp), "b2": pad_b(params["b2"], Dp),
        "w3": pad_w(params["w3"], Dp), "b3": pad_b(params["b3"], Dp),
        "w4": pad_w(params["w4"], Np), "b4": pad_b(params["b4"], Np),
    }
    # Prime the Buffered(1) capability probe outside any jit trace.
    _single_buffer_supported()
    return prepped


def discriminator_forward(x, prepped, *, tile_b=None):
    """x: (B, D) float32; prepped: output of prepare_params().
    Returns (B, 2) float32 logits."""
    B, D = x.shape
    assert D == prepped["D"], (D, prepped["D"])
    Dp = prepped["Dp"]
    Np = LANE

    if tile_b is None:
        tile_b = _pick_tile_b(B)
    Bp = _round_up(B, tile_b)

    # Zero-pad and cast the activations.  Zero-padded feature lanes remain
    # exactly zero through every layer (0 @ w = 0, bias pad = 0, LeakyReLU(0)=0).
    xp = jnp.zeros((Bp, Dp), jnp.bfloat16).at[:B, :D].set(x.astype(jnp.bfloat16))

    single_buf = _single_buffer_supported()
    const = lambda i: (0, 0)

    def resident_spec(shape):
        # Weights/biases: constant index_map -> stay VMEM-resident across grid
        # steps; single-buffer them when supported to halve resident VMEM.
        if single_buf:
            return pl.BlockSpec(shape, const, pipeline_mode=pl.Buffered(1))
        return pl.BlockSpec(shape, const)

    # --- VMEM budget -> explicit vmem_limit_bytes -------------------------
    weight_bufs = 1 if single_buf else 2
    vmem_needed = (
        weight_bufs * ((3 * Dp * Dp + Dp * Np) * 2      # weights (bf16)
                       + (3 * Dp + Np) * 4)             # biases (f32)
        + 2 * tile_b * Dp * 2                           # x tile, double-buffered (bf16)
        + 2 * tile_b * Np * 4                           # out tile, double-buffered (f32)
        + tile_b * Dp * 6                               # h scratch (f32 + bf16 repack)
    )
    vmem_limit = int(vmem_needed * 1.5) + (2 << 20)
    try:
        phys_vmem = pltpu.get_tpu_info().vmem_capacity_bytes
    except Exception:
        phys_vmem = 64 << 20                            # v7x floor
    vmem_limit = min(max(vmem_limit, 32 << 20), phys_vmem - (1 << 20))

    flops = 2 * Bp * (3 * Dp * Dp + Dp * Np)
    bytes_accessed = (Bp * Dp * 2                       # x (bf16)
                      + (3 * Dp * Dp + Dp * Np) * 2     # weights (bf16)
                      + (3 * Dp + Np) * 4               # biases (f32)
                      + Bp * Np * 4)                    # output (f32)

    grid = (Bp // tile_b,)

    out = pl.pallas_call(
        discriminator_kernel,
        out_shape=jax.ShapeDtypeStruct((Bp, Np), jnp.float32),
        grid=grid,
        in_specs=[
            pl.BlockSpec((tile_b, Dp), lambda i: (i, 0)),   # x: pipelined over batch
            resident_spec((Dp, Dp)), resident_spec((1, Dp)),
            resident_spec((Dp, Dp)), resident_spec((1, Dp)),
            resident_spec((Dp, Dp)), resident_spec((1, Dp)),
            resident_spec((Dp, Np)), resident_spec((1, Np)),
        ],
        out_specs=pl.BlockSpec((tile_b, Np), lambda i: (i, 0)),
        compiler_params=pltpu.CompilerParams(
            dimension_semantics=("parallel",),              # megacore on v7x
            vmem_limit_bytes=int(vmem_limit)),
        cost_estimate=pl.CostEstimate(
            flops=flops, transcendentals=0, bytes_accessed=bytes_accessed),
    )(xp,
      prepped["w1"], prepped["b1"],
      prepped["w2"], prepped["b2"],
      prepped["w3"], prepped["b3"],
      prepped["w4"], prepped["b4"])

    return out[:B, :LOGITS]


def init_params(key, input_dim):
    """Deterministic parameter init (PyTorch-Linear-style uniform bounds),
    stored already transposed to (in_features, out_features)."""
    dims = [(input_dim, input_dim), (input_dim, input_dim),
            (input_dim, input_dim), (input_dim, 2)]
    params = {}
    for i, (d_in, d_out) in enumerate(dims, start=1):
        key, kw, kb = jax.random.split(key, 3)
        bound = 1.0 / (d_in ** 0.5)
        params[f"w{i}"] = jax.random.uniform(kw, (d_in, d_out), jnp.float32,
                                             minval=-bound, maxval=bound)
        params[f"b{i}"] = jax.random.uniform(kb, (1, d_out), jnp.float32,
                                             minval=-bound, maxval=bound)
    return params


def reference_forward(x, params):
    """Pure-JAX f32 reference (eval-mode dropout)."""
    h = _leaky_relu(x @ params["w1"] + params["b1"])
    h = _leaky_relu(h @ params["w2"] + params["b2"])
    h = _leaky_relu(h @ params["w3"] + params["b3"])
    return h @ params["w4"] + params["b4"]


if __name__ == "__main__":
    hidden_size = 16
    input_dim = hidden_size * 2   # D = 32
    batch = 8

    key = jax.random.PRNGKey(0)
    key, kx = jax.random.split(key)
    x = jax.random.normal(kx, (batch, input_dim), jnp.float32)

    params = init_params(key, input_dim)

    # One-time padding / bf16 cast of the weights; per-call work is only the
    # kernel itself (plus the small x pad/cast, fused under jit).
    prepped = prepare_params(params)
    fwd = jax.jit(lambda xx: discriminator_forward(xx, prepped))

    out = jax.block_until_ready(fwd(x))

    ref = reference_forward(x, params)
    assert out.shape == (batch, 2), out.shape
    # bf16 MXU inputs with f32 accumulation -> relaxed tolerance vs f32 reference.
    max_err = float(jnp.max(jnp.abs(out - ref)))
    assert jnp.allclose(out, ref, atol=5e-2, rtol=5e-2), (
        f"mismatch vs JAX reference, max abs err = {max_err}")

    print("KERNEL_OK")
</pallas_src>

<mosaic_0001>
module attributes {stable_mosaic.version = 11 : i64} {
  func.func @_probe(%arg0: i32, %arg1: memref<8x128xf32, #tpu.memory_space<vmem>>, %arg2: memref<8x128xf32, #tpu.memory_space<vmem>>) attributes {dimension_semantics = [#tpu.dimension_semantics<arbitrary>], iteration_bounds = array<i64: 2>, scalar_prefetch = 0 : i64, scratch_operands = 0 : i64, tpu.core_type = #tpu.core_type<tc>, window_params = [{pipeline_mode = #tpu.pipeline_mode<synchronous>, transform_indices = @transform_0, window_bounds = array<i64: 8, 128>}, {pipeline_mode = #tpu.pipeline_mode<synchronous>, transform_indices = @transform_1, window_bounds = array<i64: 8, 128>}]} {
    %c0 = arith.constant 0 : index
    %c0_0 = arith.constant 0 : index
    %0 = vector.load %arg1[%c0, %c0_0] : memref<8x128xf32, #tpu.memory_space<vmem>>, vector<8x128xf32>
    %cst = arith.constant 1.000000e+00 : f32
    %1 = vector.broadcast %cst : f32 to vector<8x128xf32>
    %2 = arith.addf %0, %1 : vector<8x128xf32>
    %c0_1 = arith.constant 0 : index
    %c0_2 = arith.constant 0 : index
    %3 = vector.load %arg2[%c0_1, %c0_2] : memref<8x128xf32, #tpu.memory_space<vmem>>, vector<8x128xf32>
    tpu.vector_store %arg2[%c0_1, %c0_2], %2 {strides = array<i32>} : memref<8x128xf32, #tpu.memory_space<vmem>>, vector<8x128xf32>,
    return
  }
  func.func @transform_0(%arg0: i32) -> (i32, i32) {
    %c0_i32 = arith.constant 0 : i32
    %c0_i32_0 = arith.constant 0 : i32
    %c0_i32_1 = arith.constant 0 : i32
    return %c0_i32, %c0_i32_0 : i32, i32
  }
  func.func @transform_1(%arg0: i32) -> (i32, i32) {
    %c0_i32 = arith.constant 0 : i32
    %c0_i32_0 = arith.constant 0 : i32
    %c0_i32_1 = arith.constant 0 : i32
    return %c0_i32, %c0_i32_0 : i32, i32
  }
}

module attributes {stable_mosaic.version = 11 : i64} {
  func.func @discriminator_kernel(%arg0: i32, %arg1: memref<16x128xbf16, #tpu.memory_space<vmem>>, %arg2: memref<128x128xbf16, #tpu.memory_space<vmem>>, %arg3: memref<1x128xf32, #tpu.memory_space<vmem>>, %arg4: memref<128x128xbf16, #tpu.memory_space<vmem>>, %arg5: memref<1x128xf32, #tpu.memory_space<vmem>>, %arg6: memref<128x128xbf16, #tpu.memory_space<vmem>>, %arg7: memref<1x128xf32, #tpu.memory_space<vmem>>, %arg8: memref<128x128xbf16, #tpu.memory_space<vmem>>, %arg9: memref<1x128xf32, #tpu.memory_space<vmem>>, %arg10: memref<16x128xf32, #tpu.memory_space<vmem>>) attributes {dimension_semantics = [#tpu.dimension_semantics<parallel>], iteration_bounds = array<i64: 1>, scalar_prefetch = 0 : i64, scratch_operands = 0 : i64, tpu.core_type = #tpu.core_type<tc>, window_params = [{transform_indices = @transform_0, window_bounds = array<i64: 16, 128>}, {pipeline_mode = #tpu.pipeline_mode<synchronous>, transform_indices = @transform_1, window_bounds = array<i64: 128, 128>}, {pipeline_mode = #tpu.pipeline_mode<synchronous>, transform_indices = @transform_2, window_bounds = array<i64: 1, 128>}, {pipeline_mode = #tpu.pipeline_mode<synchronous>, transform_indices = @transform_3, window_bounds = array<i64: 128, 128>}, {pipeline_mode = #tpu.pipeline_mode<synchronous>, transform_indices = @transform_4, window_bounds = array<i64: 1, 128>}, {pipeline_mode = #tpu.pipeline_mode<synchronous>, transform_indices = @transform_5, window_bounds = array<i64: 128, 128>}, {pipeline_mode = #tpu.pipeline_mode<synchronous>, transform_indices = @transform_6, window_bounds = array<i64: 1, 128>}, {pipeline_mode = #tpu.pipeline_mode<synchronous>, transform_indices = @transform_7, window_bounds = array<i64: 128, 128>}, {pipeline_mode = #tpu.pipeline_mode<synchronous>, transform_indices = @transform_8, window_bounds = array<i64: 1, 128>}, {transform_indices = @transform_9, window_bounds = array<i64: 16, 128>}]} {
    %c0 = arith.constant 0 : index
    %c0_0 = arith.constant 0 : index
    %0 = vector.load %arg1[%c0, %c0_0] : memref<16x128xbf16, #tpu.memory_space<vmem>>, vector<16x128xbf16>
    %c0_1 = arith.constant 0 : index
    %c0_2 = arith.constant 0 : index
    %1 = vector.load %arg2[%c0_1, %c0_2] : memref<128x128xbf16, #tpu.memory_space<vmem>>, vector<128x128xbf16>
    %cst = arith.constant dense<0.000000e+00> : vector<16x128xf32>
    %2 = tpu.matmul %0, %1, %cst {dimension_numbers = #tpu.dot_dimension_numbers<[1], [0], [0], [1], [0, 0, 1, 1], [], []>} : vector<16x128xbf16>, vector<128x128xbf16>, vector<16x128xf32> -> vector<16x128xf32>
    %c0_3 = arith.constant 0 : index
    %c0_4 = arith.constant 0 : index
    %3 = vector.load %arg3[%c0_3, %c0_4] : memref<1x128xf32, #tpu.memory_space<vmem>>, vector<1x128xf32>
    %4 = vector.broadcast %3 : vector<1x128xf32> to vector<16x128xf32>
    %5 = arith.addf %2, %4 : vector<16x128xf32>
    %cst_5 = arith.constant 2.000000e-01 : f32
    %6 = vector.broadcast %cst_5 : f32 to vector<16x128xf32>
    %7 = arith.mulf %6, %5 : vector<16x128xf32>
    %8 = arith.maximumf %5, %7 : vector<16x128xf32>
    %9 = arith.truncf %8 : vector<16x128xf32> to vector<16x128xbf16>
    %c0_6 = arith.constant 0 : index
    %c0_7 = arith.constant 0 : index
    %10 = vector.load %arg4[%c0_6, %c0_7] : memref<128x128xbf16, #tpu.memory_space<vmem>>, vector<128x128xbf16>
    %cst_8 = arith.constant dense<0.000000e+00> : vector<16x128xf32>
    %11 = tpu.matmul %9, %10, %cst_8 {dimension_numbers = #tpu.dot_dimension_numbers<[1], [0], [0], [1], [0, 0, 1, 1], [], []>} : vector<16x128xbf16>, vector<128x128xbf16>, vector<16x128xf32> -> vector<16x128xf32>
    %c0_9 = arith.constant 0 : index
    %c0_10 = arith.constant 0 : index
    %12 = vector.load %arg5[%c0_9, %c0_10] : memref<1x128xf32, #tpu.memory_space<vmem>>, vector<1x128xf32>
    %13 = vector.broadcast %12 : vector<1x128xf32> to vector<16x128xf32>
    %14 = arith.addf %11, %13 : vector<16x128xf32>
    %cst_11 = arith.constant 2.000000e-01 : f32
    %15 = vector.broadcast %cst_11 : f32 to vector<16x128xf32>
    %16 = arith.mulf %15, %14 : vector<16x128xf32>
    %17 = arith.maximumf %14, %16 : vector<16x128xf32>
    %18 = arith.truncf %17 : vector<16x128xf32> to vector<16x128xbf16>
    %c0_12 = arith.constant 0 : index
    %c0_13 = arith.constant 0 : index
    %19 = vector.load %arg6[%c0_12, %c0_13] : memref<128x128xbf16, #tpu.memory_space<vmem>>, vector<128x128xbf16>
    %cst_14 = arith.constant dense<0.000000e+00> : vector<16x128xf32>
    %20 = tpu.matmul %18, %19, %cst_14 {dimension_numbers = #tpu.dot_dimension_numbers<[1], [0], [0], [1], [0, 0, 1, 1], [], []>} : vector<16x128xbf16>, vector<128x128xbf16>, vector<16x128xf32> -> vector<16x128xf32>
    %c0_15 = arith.constant 0 : index
    %c0_16 = arith.constant 0 : index
    %21 = vector.load %arg7[%c0_15, %c0_16] : memref<1x128xf32, #tpu.memory_space<vmem>>, vector<1x128xf32>
    %22 = vector.broadcast %21 : vector<1x128xf32> to vector<16x128xf32>
    %23 = arith.addf %20, %22 : vector<16x128xf32>
    %cst_17 = arith.constant 2.000000e-01 : f32
    %24 = vector.broadcast %cst_17 : f32 to vector<16x128xf32>
    %25 = arith.mulf %24, %23 : vector<16x128xf32>
    %26 = arith.maximumf %23, %25 : vector<16x128xf32>
    %27 = arith.truncf %26 : vector<16x128xf32> to vector<16x128xbf16>
    %c0_18 = arith.constant 0 : index
    %c0_19 = arith.constant 0 : index
    %28 = vector.load %arg8[%c0_18, %c0_19] : memref<128x128xbf16, #tpu.memory_space<vmem>>, vector<128x128xbf16>
    %cst_20 = arith.constant dense<0.000000e+00> : vector<16x128xf32>
    %29 = tpu.matmul %27, %28, %cst_20 {dimension_numbers = #tpu.dot_dimension_numbers<[1], [0], [0], [1], [0, 0, 1, 1], [], []>} : vector<16x128xbf16>, vector<128x128xbf16>, vector<16x128xf32> -> vector<16x128xf32>
    %c0_21 = arith.constant 0 : index
    %c0_22 = arith.constant 0 : index
    %30 = vector.load %arg9[%c0_21, %c0_22] : memref<1x128xf32, #tpu.memory_space<vmem>>, vector<1x128xf32>
    %31 = vector.broadcast %30 : vector<1x128xf32> to vector<16x128xf32>
    %32 = arith.addf %29, %31 : vector<16x128xf32>
    %c0_23 = arith.constant 0 : index
    %c0_24 = arith.constant 0 : index
    %33 = vector.load %arg10[%c0_23, %c0_24] : memref<16x128xf32, #tpu.memory_space<vmem>>, vector<16x128xf32>
    tpu.vector_store %arg10[%c0_23, %c0_24], %32 {strides = array<i32>} : memref<16x128xf32, #tpu.memory_space<vmem>>, vector<16x128xf32>,
    return
  }
  func.func @transform_0(%arg0: i32) -> (i32, i32) {
    %c0_i32 = arith.constant 0 : i32
    %c0_i32_0 = arith.constant 0 : i32
    return %arg0, %c0_i32 : i32, i32
  }
  func.func @transform_1(%arg0: i32) -> (i32, i32) {
    %c0_i32 = arith.constant 0 : i32
    %c0_i32_0 = arith.constant 0 : i32
    %c0_i32_1 = arith.constant 0 : i32
    return %c0_i32, %c0_i32_0 : i32, i32
  }
  func.func @transform_2(%arg0: i32) -> (i32, i32) {
    %c0_i32 = arith.constant 0 : i32
    %c0_i32_0 = arith.constant 0 : i32
    %c0_i32_1 = arith.constant 0 : i32
    return %c0_i32, %c0_i32_0 : i32, i32
  }
  func.func @transform_3(%arg0: i32) -> (i32, i32) {
    %c0_i32 = arith.constant 0 : i32
    %c0_i32_0 = arith.constant 0 : i32
    %c0_i32_1 = arith.constant 0 : i32
    return %c0_i32, %c0_i32_0 : i32, i32
  }
  func.func @transform_4(%arg0: i32) -> (i32, i32) {
    %c0_i32 = arith.constant 0 : i32
    %c0_i32_0 = arith.constant 0 : i32
    %c0_i32_1 = arith.constant 0 : i32
    return %c0_i32, %c0_i32_0 : i32, i32
  }
  func.func @transform_5(%arg0: i32) -> (i32, i32) {
    %c0_i32 = arith.constant 0 : i32
    %c0_i32_0 = arith.constant 0 : i32
    %c0_i32_1 = arith.constant 0 : i32
    return %c0_i32, %c0_i32_0 : i32, i32
  }
  func.func @transform_6(%arg0: i32) -> (i32, i32) {
    %c0_i32 = arith.constant 0 : i32
    %c0_i32_0 = arith.constant 0 : i32
    %c0_i32_1 = arith.constant 0 : i32
    return %c0_i32, %c0_i32_0 : i32, i32
  }
  func.func @transform_7(%arg0: i32) -> (i32, i32) {
    %c0_i32 = arith.constant 0 : i32
    %c0_i32_0 = arith.constant 0 : i32
    %c0_i32_1 = arith.constant 0 : i32
    return %c0_i32, %c0_i32_0 : i32, i32
  }
  func.func @transform_8(%arg0: i32) -> (i32, i32) {
    %c0_i32 = arith.constant 0 : i32
    %c0_i32_0 = arith.constant 0 : i32
    %c0_i32_1 = arith.constant 0 : i32
    return %c0_i32, %c0_i32_0 : i32, i32
  }
  func.func @transform_9(%arg0: i32) -> (i32, i32) {
    %c0_i32 = arith.constant 0 : i32
    %c0_i32_0 = arith.constant 0 : i32
    return %arg0, %c0_i32 : i32, i32
  }
}

</mosaic_0001>

<bundles_post_ra>
// kernel: tpu_custom_call.1
= control target key start
LH: loop header
LB: loop body
LE: loop exit
PB: predicated region body
PF: predicated region fallthrough
CT: control target
= control target key end

     0   :  { %6 = vsyncpa [#allocation3], 0  ;;  %s341_s0 = inlined_call_operand.hbm [shape: f32[8,128], index: 0, kind: input, shape index: {}]   ;;  %s342_s1 = inlined_call_operand.hbm [shape: f32[8,128], index: 1, kind: output, shape index: {}]  }
   0x1   :  { %7 = vsyncpa [#allocation4], 0  ;;  %s262_s6 = smov 0  }
   0x2 LB: > { %s145_s7 = sadd.s32 4294967295, %s248_s6   ;;  %p146_p0 = scmp.ge.s32.totalorder %s248_s6, 1  ;;  %s248_s6 = sphi %s262_s6, %s13_s6  }
   0x3   : > { %p60_p1 = scmp.lt.s32.totalorder %s248_s6, 3  ;;  %p276_p3 = scmp.eq.s32.totalorder %s145_s7, 0 }
   0x4   : > { %s250_s10 = smov [#allocation2]   ;;  %s180_s15 = scalar_lea.hbm %s341_s0, 128 }
   0x5   : > { %p270_p2 = pnand %p146_p0, %p60_p1  ;;  %s73_s11 = sshll.u32 %s250_s10, 4  ;;  %s74_s11 = int_to_ptr.vmem [resolvable:$true] %s73_s11 }
   0x6   : > { %s347_s9 = scalar_select %p276_p3, 1, 0 }
   0x7   : > { %s346_s8 = scalar_select %p270_p2, 1, 0 }
   0x8   : > { %p162_p4 = pneg %p270_p2  ;;  %p181_p6 = scmp.ne.s32.totalorder %s341_s0, %s180_s15 }
   0x9   : > { %p187_p10 = scmp.lt.u32.totalorder %s180_s15, %s341_s0 }
   0xa   : > { %p284_p5 = pnand %p276_p3, %p162_p4 }
   0xc   : > { %p182_p7 = pneg %p284_p5 }
   0xe   : > { %p183_p8 = pnand %p182_p7, %p181_p6 }
  0x10   : > { %p184_p9 = pneg %p183_p8 }
  0x12   : > { %p189_p11 = pnand %p187_p10, %p184_p9 }
  0x14   : > { %192 = shalt.err (!%p189_p11)
}
  0x15   : > { %s193_s20 = scalar_lea.vmem %s74_s11, 128  ;;  %p201_p1 = scmp.lt.s32.totalorder %s74_s11, %s74_s11 }
  0x16   : > { %p194_p12 = scmp.ne.s32.totalorder %s74_s11, %s193_s20  ;;  %p202_p4 = scmp.lt.s32.totalorder %s193_s20, %s193_s20 }
  0x18   : > { %p196_p13 = pnand %p194_p12, %p182_p7  ;;  %p203_p3 = por %p202_p4, %p201_p1 }
  0x1a   : > { %p197_p0 = pneg %p196_p13 }
  0x1c   : > { %p204_p2 = pnand %p203_p3, %p197_p0 }
  0x1e   : > { %207 = shalt.err (!%p204_p2)
}
  0x1f   : > { %165 = dma.hbm_to_vmem [thread:$0]  (!%p284_p5), %s341_s0, 128, %s74_s11, [#allocation3]  }
  0x20   : > { %p349_p6 = scmp.ne.s32.totalorder %s346_s8, 0 }
  0x21   : > { %p350_p8 = scmp.ne.s32.totalorder (!%p349_p6), %s347_s9, 0 }
  0x22   : > { %86 = sbr.rel (%p349_p6) target bundleno = 67 (0x43), region = 24 }
  0x29   : > { %239 = dma.done.wait (%p350_p8), [#allocation3], 128  }
  0x2a   : > { %241 = vsyncadd (%p350_p8), [#allocation3], 4294967168  ;;  %s251_s23 = smov [#allocation5]   ;;  %v96_v0 = vld [vmem:[#allocation2] sm:$0xff]  ;;  %p312_p2 = scmp.eq.s32.totalorder %s145_s7, 1 }
  0x2b   : > { %s106_s24 = sshll.u32 %s251_s23, 4  ;;  %v97_v1 = vadd.f32 1.0, %v96_v0  ;;  %s107_s24 = int_to_ptr.vmem [resolvable:$true] %s106_s24 }
  0x2c   : > { %s208_s26 = scalar_lea.vmem %s107_s24, 128  ;;  %p215_p9 = scmp.lt.s32.totalorder %s107_s24, %s107_s24 }
  0x2d   : > { %98 = vst [vmem:[#allocation5] sm:$0xff] %v97_v1  ;;  %p209_p3 = scmp.ne.s32.totalorder %s107_s24, %s208_s26  ;;  %p216_p10 = scmp.lt.s32.totalorder %s208_s26, %s208_s26 }
  0x2f   : > { %p210_p5 = pnand %p209_p3, %p312_p2  ;;  %p217_p11 = por %p216_p10, %p215_p9 }
  0x31   : > { %p211_p7 = pneg %p210_p5 }
  0x33   : > { %p218_p12 = pnand %p217_p11, %p211_p7 }
  0x35   : > { %221 = shalt.err (!%p218_p12)
}
  0x36   : > { %s222_s29 = scalar_lea.hbm %s342_s1, 128 }
  0x37   : > { %p223_p13 = scmp.ne.s32.totalorder %s342_s1, %s222_s29  ;;  %p228_p4 = scmp.lt.u32.totalorder %s222_s29, %s342_s1 }
  0x39   : > { %p224_p0 = pnand %p223_p13, %p312_p2 }
  0x3b   : > { %p225_p1 = pneg %p224_p0 }
  0x3d   : > { %p230_p6 = pnand %p228_p4, %p225_p1 }
  0x3f   : > { %233 = shalt.err (!%p230_p6)
}
  0x40   : > { %159 = dma.vmem_to_hbm [thread:$0]  (%p312_p2), %s107_s24, 128, %s342_s1, [#allocation4]  }
  0x41   : > { %243 = dma.done.wait (%p312_p2), [#allocation4], 128  }
  0x42   : > { %245 = vsyncadd (%p312_p2), [#allocation4], 4294967168 }
  0x43 PF: > { %s13_s6 = sadd.s32 1, %s248_s6  }
  0x44   : > { %p10_p8 = scmp.ge.s32.totalorder %s13_s6, 4  }
  0x46   :  { %12 = sbr.rel (!%p10_p8) target bundleno = 2 (0x2), region = 53 }
  0x4d   :  { %119 = vsyncpa [#allocation3], 1 }
  0x4e   :  { %121 = vsyncpa [#allocation3 + $0x1], 1 }
  0x4f   :  { %122 = vsyncpa [#allocation4], 1 }
  0x50   :  { %124 = vsyncpa [#allocation4 + $0x1], 1 }

// kernel: _lambda_.1
= control target key start
LH: loop header
LB: loop body
LE: loop exit
PB: predicated region body
PF: predicated region fallthrough
CT: control target
= control target key end

     0   :  { %14 = vsyncpa [#allocation3], 0  ;;  %s1010_s0 = inlined_call_operand.vmem [shape: bf16[16,128], index: 0, kind: input, shape index: {}]   ;;  %s1011_s1 = inlined_call_operand.hbm [shape: bf16[128,128], index: 1, kind: input, shape index: {}]   ;;  %s1012_s2 = inlined_call_operand.vmem [shape: f32[1,128], index: 2, kind: input, shape index: {}]   ;;  %s1013_s3 = inlined_call_operand.hbm [shape: bf16[128,128], index: 3, kind: input, shape index: {}]   ;;  %s1014_s4 = inlined_call_operand.vmem [shape: f32[1,128], index: 4, kind: input, shape index: {}]   ;;  %s1015_s5 = inlined_call_operand.hbm [shape: bf16[128,128], index: 5, kind: input, shape index: {}]   ;;  %s1016_s6 = inlined_call_operand.vmem [shape: f32[1,128], index: 6, kind: input, shape index: {}]   ;;  %s1017_s7 = inlined_call_operand.vmem [shape: bf16[128,128], index: 7, kind: input, shape index: {}]   ;;  %s1018_s8 = inlined_call_operand.vmem [shape: f32[1,128], index: 8, kind: input, shape index: {}]   ;;  %s1019_s9 = inlined_call_operand.vmem [shape: f32[16,128], index: 9, kind: output, shape index: {}]  }
   0x1   :  { %15 = vsyncpa [#allocation5], 0  ;;  %s816_s30 = smov [#allocation4]   ;;  %s817_s11 = smov [#allocation2]  }
   0x2   :  { %s37_s10 = sshll.u32 %s816_s30, 4  ;;  %s23_s12 = sshll.u32 %s817_s11, 4  ;;  %s38_s10 = int_to_ptr.vmem [resolvable:$true] %s37_s10  ;;  %s873_s12 = int_to_ptr.vmem [resolvable:$true] %s23_s12 }
   0x3   :  { %s746_s15 = scalar_lea.hbm %s1013_s3, 1024 }
   0x4   :  { %p747_p0 = scmp.ne.s32.totalorder %s1013_s3, %s746_s15  ;;  %p750_p1 = scmp.lt.u32.totalorder %s746_s15, %s1013_s3 }
   0x6   :  { %p752_p2 = pnand %p750_p1, %p747_p0 }
   0x8   :  { %755 = shalt.err (!%p752_p2)
}
   0x9   :  { %s756_s20 = scalar_lea.vmem %s38_s10, 1024  ;;  %p761_p4 = scmp.lt.s32.totalorder %s38_s10, %s38_s10 }
   0xa   :  { %p757_p3 = scmp.ne.s32.totalorder %s38_s10, %s756_s20  ;;  %p762_p5 = scmp.lt.s32.totalorder %s756_s20, %s756_s20 }
   0xc   :  { %p763_p6 = por %p762_p5, %p761_p4 }
   0xe   :  { %p764_p7 = pnand %p763_p6, %p757_p3 }
  0x10   :  { %767 = shalt.err (!%p764_p7)
}
  0x11   :  { %s818_s21 = smov 64   ;;  %s819_s22 = smov 4  }
  0x12   :  { %43 = dma.hbm_to_vmem [thread:$0]  %s1013_s3, 1024, %s38_s10, [#allocation5], %s818_s21, %s818_s21, %s819_s22  }
  0x13   :  { %s768_s27 = scalar_lea.hbm %s1011_s1, 1024 }
  0x14   :  { %p769_p8 = scmp.ne.s32.totalorder %s1011_s1, %s768_s27  ;;  %p772_p9 = scmp.lt.u32.totalorder %s768_s27, %s1011_s1 }
  0x16   :  { %p774_p10 = pnand %p772_p9, %p769_p8 }
  0x18   :  { %777 = shalt.err (!%p774_p10)
}
  0x19   :  { %s778_s13 = scalar_lea.vmem %s873_s12, 1024  ;;  %p783_p12 = scmp.lt.s32.totalorder %s873_s12, %s873_s12 }
  0x1a   :  { %p779_p11 = scmp.ne.s32.totalorder %s873_s12, %s778_s13  ;;  %p784_p13 = scmp.lt.s32.totalorder %s778_s13, %s778_s13 }
  0x1c   :  { %p785_p0 = por %p784_p13, %p783_p12 }
  0x1e   :  { %p786_p1 = pnand %p785_p0, %p779_p11 }
  0x20   :  { %789 = shalt.err (!%p786_p1)
}
  0x21   :  { %29 = dma.hbm_to_vmem [thread:$0]  %s1011_s1, 1024, %s873_s12, [#allocation3], %s818_s21, %s818_s21, %s819_s22  }
  0x22   :  { %s820_s14 = smov [#allocation6]   ;;  %s790_s18 = scalar_lea.hbm %s1015_s5, 1024 }
  0x23   :  { %s51_s15 = sshll.u32 %s820_s14, 4  ;;  %p791_p2 = scmp.ne.s32.totalorder %s1015_s5, %s790_s18  ;;  %s52_s15 = int_to_ptr.vmem [resolvable:$true] %s51_s15 }
  0x24   :  { %p794_p3 = scmp.lt.u32.totalorder %s790_s18, %s1015_s5 }
  0x26   :  { %p796_p4 = pnand %p794_p3, %p791_p2 }
  0x28   :  { %799 = shalt.err (!%p796_p4)
}
  0x29   :  { %s800_s25 = scalar_lea.vmem %s52_s15, 1024  ;;  %p805_p6 = scmp.lt.s32.totalorder %s52_s15, %s52_s15 }
  0x2a   :  { %p801_p5 = scmp.ne.s32.totalorder %s52_s15, %s800_s25  ;;  %p806_p7 = scmp.lt.s32.totalorder %s800_s25, %s800_s25 }
  0x2c   :  { %p807_p8 = por %p806_p7, %p805_p6 }
  0x2e   :  { %p808_p9 = pnand %p807_p8, %p801_p5 }
  0x30   :  { %811 = shalt.err (!%p808_p9)
}
  0x31   :  { %57 = dma.hbm_to_vmem [thread:$0]  %s1015_s5, 1024, %s52_s15, [#allocation5], %s818_s21, %s818_s21, %s819_s22  }
  0x32   :  { %812 = dma.done.wait [#allocation3], 1024  }
  0x33   :  { %813 = vsyncadd [#allocation3], 4294966272 }
  0x34   :  { %814 = dma.done.wait [#allocation5], 2048  }
  0x35   :  { %815 = vsyncadd [#allocation5], 4294965248  ;;  %v821_v0 = vmov 0.0   ;;  %vm822_vm0 = vmmov 0   ;;  %v713_v1 = vld [vmem:[#allocation2] sm:$0xff]   ;;  %v714_v2 = vld [vmem:[#allocation2 + $0x8] sm:$0xff]  }
  0x36   :  { %626 = vmatprep.subr.bf16.mxu0 %v821_v0  ;;  %642 = vmatprep.mubr.msk.bf16.mxu0 %vm822_vm0, %v821_v0  ;;  %v715_v3 = vld [vmem:[#allocation2 + $0x10] sm:$0xff]   ;;  %v722_v4 = vld [vmem:[#allocation4] sm:$0xff]   ;;  %v716_v5 = vld [vmem:[#allocation2 + $0x18] sm:$0xff]  }
  0x37   :  { %646 = vmatprep.subr.bf16.mxu1 %v821_v0  ;;  %662 = vmatprep.mubr.msk.bf16.mxu1 %vm822_vm0, %v821_v0  ;;  %v723_v6 = vld [vmem:[#allocation4 + $0x8] sm:$0xff]   ;;  %v717_v7 = vld [vmem:[#allocation2 + $0x20] sm:$0xff]   ;;  %v724_v8 = vld [vmem:[#allocation4 + $0x10] sm:$0xff]  }
  0x38   :  { %627 = vmatpush3.bf16.msra.mxu0 %v713_v1  ;;  %647 = vmatpush3.bf16.msra.mxu1 %v722_v4  ;;  %v718_v9 = vld [vmem:[#allocation2 + $0x28] sm:$0xff]   ;;  %v725_v10 = vld [vmem:[#allocation4 + $0x18] sm:$0xff]   ;;  %v719_v11 = vld [vmem:[#allocation2 + $0x30] sm:$0xff]  }
  0x39   :  { %628 = vmatprep.subr.bf16.mxu0 %v821_v0  ;;  %648 = vmatprep.subr.bf16.mxu1 %v821_v0  ;;  %v726_v12 = vld [vmem:[#allocation4 + $0x20] sm:$0xff]   ;;  %v720_v13 = vld [vmem:[#allocation2 + $0x38] sm:$0xff]   ;;  %v727_v15 = vld [vmem:[#allocation4 + $0x28] sm:$0xff]  }
  0x3a   :  { %v721_v14 = vld [vmem:[%s1010_s0] sm:$0xff]   ;;  %v728_v16 = vld [vmem:[#allocation4 + $0x30] sm:$0xff]   ;;  %v729_v17 = vld [vmem:[#allocation4 + $0x38] sm:$0xff]  }
  0x3b   :  { %v730_v18 = vld [vmem:[#allocation6] sm:$0xff]   ;;  %v731_v19 = vld [vmem:[#allocation6 + $0x8] sm:$0xff]   ;;  %v732_v20 = vld [vmem:[#allocation6 + $0x10] sm:$0xff]  }
  0x3c   :  { %629 = vmatpush3.bf16.msra.mxu0 %v714_v2  ;;  %649 = vmatpush3.bf16.msra.mxu1 %v723_v6  ;;  %v733_v21 = vld [vmem:[#allocation6 + $0x18] sm:$0xff]   ;;  %v734_v22 = vld [vmem:[#allocation6 + $0x20] sm:$0xff]   ;;  %v735_v35 = vld [vmem:[#allocation6 + $0x28] sm:$0xff]  }
  0x3d   :  { %630 = vmatprep.subr.bf16.mxu0 %v821_v0  ;;  %650 = vmatprep.subr.bf16.mxu1 %v821_v0  ;;  %v553_v23 = vld [vmem:[%s1012_s2] ss:$0 sm:$0xff]  ;;  %v736_v36 = vld [vmem:[#allocation6 + $0x30] sm:$0xff]   ;;  %v737_v37 = vld [vmem:[#allocation6 + $0x38] sm:$0xff]  }
  0x3e   :  { %v738_v38 = vld [vmem:[%s1017_s7] sm:$0xff]   ;;  %v739_v39 = vld [vmem:[%s1017_s7 + $0x8] sm:$0xff]   ;;  %v740_v40 = vld [vmem:[%s1017_s7 + $0x10] sm:$0xff]  }
  0x3f   :  { %v741_v41 = vld [vmem:[%s1017_s7 + $0x18] sm:$0xff]   ;;  %v742_v42 = vld [vmem:[%s1017_s7 + $0x20] sm:$0xff]   ;;  %v743_v55 = vld [vmem:[%s1017_s7 + $0x28] sm:$0xff]  }
  0x40   :  { %631 = vmatpush3.bf16.msra.mxu0 %v715_v3  ;;  %651 = vmatpush3.bf16.msra.mxu1 %v724_v8  ;;  %v563_v43 = vld [vmem:[%s1014_s4] ss:$0 sm:$0xff]  ;;  %v744_v56 = vld [vmem:[%s1017_s7 + $0x30] sm:$0xff]   ;;  %v745_v57 = vld [vmem:[%s1017_s7 + $0x38] sm:$0xff]  }
  0x41   :  { %632 = vmatprep.subr.bf16.mxu0 %v821_v0  ;;  %652 = vmatprep.subr.bf16.mxu1 %v821_v0  ;;  %v572_v58 = vld [vmem:[%s1016_s6] ss:$0 sm:$0xff] }
  0x42   :  { %v581_v6 = vld [vmem:[%s1018_s8] ss:$0 sm:$0xff] }
  0x44   :  { %633 = vmatpush3.bf16.msra.mxu0 %v716_v5  ;;  %653 = vmatpush3.bf16.msra.mxu1 %v725_v10 }
  0x45   :  { %634 = vmatprep.subr.bf16.mxu0 %v821_v0  ;;  %654 = vmatprep.subr.bf16.mxu1 %v821_v0 }
  0x48   :  { %635 = vmatpush3.bf16.msra.mxu0 %v717_v7  ;;  %655 = vmatpush3.bf16.msra.mxu1 %v726_v12 }
  0x49   :  { %636 = vmatprep.subr.bf16.mxu0 %v821_v0  ;;  %656 = vmatprep.subr.bf16.mxu1 %v821_v0 }
  0x4c   :  { %637 = vmatpush3.bf16.msra.mxu0 %v718_v9  ;;  %657 = vmatpush3.bf16.msra.mxu1 %v727_v15 }
  0x4d   :  { %638 = vmatprep.subr.bf16.mxu0 %v821_v0  ;;  %658 = vmatprep.subr.bf16.mxu1 %v821_v0 }
  0x50   :  { %639 = vmatpush3.bf16.msra.mxu0 %v719_v11  ;;  %659 = vmatpush3.bf16.msra.mxu1 %v728_v16 }
  0x51   :  { %640 = vmatprep.subr.bf16.mxu0 %v821_v0  ;;  %660 = vmatprep.subr.bf16.mxu1 %v821_v0 }
  0x54   :  { %641 = vmatpush3.bf16.msra.mxu0 %v720_v13  ;;  %661 = vmatpush3.bf16.msra.mxu1 %v729_v17 }
  0x55   :  { %666 = vmatprep.subr.bf16.mxu0 %v821_v0  ;;  %686 = vmatprep.subr.bf16.mxu1 %v821_v0 }
  0x57   :  { %643 = vmatmul.mubr.bf16.vlgmr.msra.gmra.mrb[0].mxu0 %v721_v14 }
  0x58   :  { %682 = vmatprep.mubr.msk.bf16.mxu0 %vm822_vm0, %v821_v0  ;;  %667 = vmatpush3.bf16.msra.mxu0 %v730_v18 }
  0x59   :  { %668 = vmatprep.subr.bf16.mxu0 %v821_v0 }
  0x5c   :  { %669 = vmatpush3.bf16.msra.mxu0 %v731_v19 }
  0x5d   :  { %670 = vmatprep.subr.bf16.mxu0 %v821_v0 }
  0x60   :  { %671 = vmatpush3.bf16.msra.mxu0 %v732_v20 }
  0x61   :  { %672 = vmatprep.subr.bf16.mxu0 %v821_v0 }
  0x64   :  { %673 = vmatpush3.bf16.msra.mxu0 %v733_v21 }
  0x65   :  { %674 = vmatprep.subr.bf16.mxu0 %v821_v0 }
  0x68   :  { %675 = vmatpush3.bf16.msra.mxu0 %v734_v22 }
  0x69   :  { %676 = vmatprep.subr.bf16.mxu0 %v821_v0 }
  0x6c   :  { %677 = vmatpush3.bf16.msra.mxu0 %v735_v35 }
  0x6d   :  { %678 = vmatprep.subr.bf16.mxu0 %v821_v0 }
  0x70   :  { %679 = vmatpush3.bf16.msra.mxu0 %v736_v36 }
  0x71   :  { %680 = vmatprep.subr.bf16.mxu0 %v821_v0 }
  0x74   :  { %681 = vmatpush3.bf16.msra.mxu0 %v737_v37 }
 0x12a   :  { %v187_v24 = vpop.f32.mrb[0].mxu0 }
 0x12b   :  { %v188_v25 = vadd.f32 %v553_v23, %v187_v24  ;;  %v644_v26 = vpop.f32.mrb[1].mxu0 }
 0x12c   :  { %v190_v27 = vpop.f32.mrb[2].mxu0 }
 0x12d   :  { %v194_v28 = vmul.f32 0.2, %v188_v25  ;;  %v191_v29 = vadd.f32 %v553_v23, %v190_v27  ;;  %v645_v30 = vpop.f32.mrb[3].mxu0 }
 0x12f   :  { %v195_v31 = vmul.f32 0.2, %v191_v29  ;;  %v196_v32 = vmax.f32 %v188_v25, %v194_v28 }
 0x131   :  { %v197_v33 = vmax.f32 %v191_v29, %v195_v31 }
 0x133   :  { %v198_v34 = vpack.c.bf16 %v197_v33, %v196_v32 }
 0x135   :  { %663 = vmatmul.mubr.bf16.vlgmr.msra.gmra.mrb[0].mxu1 %v198_v34 }
 0x136   :  { %702 = vmatprep.mubr.msk.bf16.mxu1 %vm822_vm0, %v821_v0  ;;  %687 = vmatpush3.bf16.msra.mxu1 %v738_v38 }
 0x137   :  { %688 = vmatprep.subr.bf16.mxu1 %v821_v0 }
 0x13a   :  { %689 = vmatpush3.bf16.msra.mxu1 %v739_v39 }
 0x13b   :  { %690 = vmatprep.subr.bf16.mxu1 %v821_v0 }
 0x13e   :  { %691 = vmatpush3.bf16.msra.mxu1 %v740_v40 }
 0x13f   :  { %692 = vmatprep.subr.bf16.mxu1 %v821_v0 }
 0x142   :  { %693 = vmatpush3.bf16.msra.mxu1 %v741_v41 }
 0x143   :  { %694 = vmatprep.subr.bf16.mxu1 %v821_v0 }
 0x146   :  { %695 = vmatpush3.bf16.msra.mxu1 %v742_v42 }
 0x147   :  { %696 = vmatprep.subr.bf16.mxu1 %v821_v0 }
 0x14a   :  { %697 = vmatpush3.bf16.msra.mxu1 %v743_v55 }
 0x14b   :  { %698 = vmatprep.subr.bf16.mxu1 %v821_v0 }
 0x14e   :  { %699 = vmatpush3.bf16.msra.mxu1 %v744_v56 }
 0x14f   :  { %700 = vmatprep.subr.bf16.mxu1 %v821_v0 }
 0x152   :  { %701 = vmatpush3.bf16.msra.mxu1 %v745_v57 }
 0x208   :  { %v304_v44 = vpop.f32.mrb[0].mxu1 }
 0x209   :  { %v305_v45 = vadd.f32 %v563_v43, %v304_v44  ;;  %v664_v46 = vpop.f32.mrb[1].mxu1 }
 0x20a   :  { %v307_v47 = vpop.f32.mrb[2].mxu1 }
 0x20b   :  { %v311_v48 = vmul.f32 0.2, %v305_v45  ;;  %v308_v49 = vadd.f32 %v563_v43, %v307_v47  ;;  %v665_v50 = vpop.f32.mrb[3].mxu1 }
 0x20d   :  { %v312_v51 = vmul.f32 0.2, %v308_v49  ;;  %v313_v52 = vmax.f32 %v305_v45, %v311_v48 }
 0x20f   :  { %v314_v53 = vmax.f32 %v308_v49, %v312_v51 }
 0x211   :  { %v315_v54 = vpack.c.bf16 %v314_v53, %v313_v52 }
 0x213   :  { %683 = vmatmul.mubr.bf16.vlgmr.msra.gmra.mrb[4].mxu0 %v315_v54 }
 0x2e6   :  { %v421_v59 = vpop.f32.mrb[4].mxu0 }
 0x2e7   :  { %v422_v60 = vadd.f32 %v572_v58, %v421_v59  ;;  %v684_v61 = vpop.f32.mrb[5].mxu0 }
 0x2e8   :  { %v424_v62 = vpop.f32.mrb[6].mxu0 }
 0x2e9   :  { %v428_v63 = vmul.f32 0.2, %v422_v60  ;;  %v425_v1 = vadd.f32 %v572_v58, %v424_v62  ;;  %v685_v2 = vpop.f32.mrb[7].mxu0 }
 0x2eb   :  { %v429_v3 = vmul.f32 0.2, %v425_v1  ;;  %v430_v4 = vmax.f32 %v422_v60, %v428_v63 }
 0x2ed   :  { %v431_v5 = vmax.f32 %v425_v1, %v429_v3 }
 0x2ef   :  { %v432_v0 = vpack.c.bf16 %v431_v5, %v430_v4 }
 0x2f1   :  { %703 = vmatmul.mubr.bf16.vlgmr.msra.gmra.mrb[4].mxu1 %v432_v0 }
 0x3c4   :  { %v538_v7 = vpop.f32.mrb[4].mxu1 }
 0x3c5   :  { %v539_v8 = vadd.f32 %v581_v6, %v538_v7  ;;  %v704_v9 = vpop.f32.mrb[5].mxu1 }
 0x3c6   :  { %v541_v10 = vpop.f32.mrb[6].mxu1 }
 0x3c7   :  { %545 = vst [vmem:[%s1019_s9] sm:$0xff] %v539_v8  ;;  %v542_v11 = vadd.f32 %v581_v6, %v541_v10  ;;  %v705_v12 = vpop.f32.mrb[7].mxu1 }
 0x3c9   :  { %546 = vst [vmem:[%s1019_s9 + $0x8] sm:$0xff] %v542_v11 }
 0x3ca   :  { %551 = vsyncpa [#allocation3], 1 }
 0x3cb   :  { %552 = vsyncpa [#allocation5], 1 }

</bundles_post_ra>
